<compile_context>
chip_gen: v6e
topology: v6e:2x2x1
jax: 0.10.0
libtpu: 0.0.40
codegen_flags: <defaults>
</compile_context>

<pallas_src>
import functools

import jax
import jax.numpy as jnp
from jax.experimental import pallas as pl
from jax.experimental.pallas import tpu as pltpu

_LANES = 128


def _weighted_ce_kernel(logits_ref, labels_ref, out_ref, num_acc, den_acc,
                        *, w0, w1):
    """One (TR, 128) batch slab per inner grid step.

    logits_ref: [2, TR, 128]  class on the leading axis, batch on (sublane, lane)
    labels_ref: [TR, 128]     int32, -1 marks batch padding
    out_ref:    [1, 8, 128]   per-split partials (sublane 0 = num, 1 = den)
    num_acc/den_acc: [TR, 128] f32 accumulators (pure elementwise updates)
    """
    i = pl.program_id(1)                       # inner ("arbitrary") batch axis

    @pl.when(i == 0)
    def _():
        num_acc[...] = jnp.zeros_like(num_acc)
        den_acc[...] = jnp.zeros_like(den_acc)

    # Widen after the DMA (bf16 inputs allowed); all accumulation is f32.
    z0 = logits_ref[0].astype(jnp.float32)     # [TR, 128] class-0 logits
    z1 = logits_ref[1].astype(jnp.float32)     # [TR, 128] class-1 logits
    labels = labels_ref[...]                   # [TR, 128] int32

    is1 = labels == 1
    valid = labels >= 0                        # mask padded batch elements
    # NOTE: labels outside {0,1,-1} are silently treated as class 0 with w0;
    # PyTorch CrossEntropyLoss would raise instead.

    # nll = -log_softmax(z)[y] = softplus(z_other - z_y), stable form:
    #   d = z_y - z_other ;  nll = max(-d, 0) + log(1 + exp(-|d|))
    d = jnp.where(is1, z1 - z0, z0 - z1)
    nll = jnp.maximum(-d, 0.0) + jnp.log(1.0 + jnp.exp(-jnp.abs(d)))

    w_i = jnp.where(valid, jnp.where(is1, w1, w0), 0.0)

    # Pure VPU elementwise accumulation; no cross-lane reduce per step.
    num_acc[...] += w_i * nll
    den_acc[...] += w_i

    @pl.when(i == pl.num_programs(1) - 1)
    def _():
        # Single cross-lane/sublane reduce per split, once at the end.
        num = jnp.sum(num_acc[...])
        den = jnp.sum(den_acc[...])
        sub = jax.lax.broadcasted_iota(jnp.int32, (8, _LANES), 0)
        out_ref[0] = jnp.where(sub == 0, num, jnp.where(sub == 1, den, 0.0))


def _round_up(x, m):
    return ((x + m - 1) // m) * m


def rawnet_loss(logits, labels, class_weights=(1.0, 9.0), *,
                row_tile=1024, split_batch=True):
    """Pallas equivalent of RawNetLoss.forward -> {'loss': scalar}.

    logits: [B, 2] (f32 or bf16), labels: [B] int.
    """
    B, C = logits.shape
    assert C == 2, "RawNetLoss is a binary (spoof/bonafide) head"
    w0 = float(class_weights[0])
    w1 = float(class_weights[1])

    # ---- 2-D (rows, 128) packing of the batch axis -------------------------
    rows_needed = max(-(-B // _LANES), 1)
    tr = min(_round_up(rows_needed, 8), _round_up(row_tile, 8))
    nsteps = -(-rows_needed // tr)
    # Optional leading "parallel" axis: splits long grids across the two
    # TensorCores on v7x; serial (harmless) on single-core v5e / v6e.
    nsplit = 2 if (split_batch and nsteps >= 4) else 1
    inner = -(-nsteps // nsplit)
    rows = nsplit * inner * tr
    bp = rows * _LANES
    pad = bp - B

    # Layout plumbing as one fused pad+transpose+reshape expression per input
    # so XLA emits a single copy feeding the pallas_call.
    if pad:
        logits_3d = jnp.pad(logits, ((0, pad), (0, 0))).T.reshape(2, rows, _LANES)
        labels_2d = jnp.pad(labels.astype(jnp.int32), ((0, pad),),
                            constant_values=-1).reshape(rows, _LANES)
    else:
        logits_3d = logits.T.reshape(2, rows, _LANES)
        labels_2d = labels.astype(jnp.int32).reshape(rows, _LANES)

    kernel = functools.partial(_weighted_ce_kernel, w0=w0, w1=w1)

    partials = pl.pallas_call(
        kernel,
        out_shape=jax.ShapeDtypeStruct((nsplit, 8, _LANES), jnp.float32),
        grid_spec=pltpu.PrefetchScalarGridSpec(
            num_scalar_prefetch=0,
            grid=(nsplit, inner),
            in_specs=[
                pl.BlockSpec((2, tr, _LANES),
                             lambda s, i: (0, s * inner + i, 0)),
                pl.BlockSpec((tr, _LANES),
                             lambda s, i: (s * inner + i, 0)),
            ],
            out_specs=pl.BlockSpec((1, 8, _LANES), lambda s, i: (s, 0, 0)),
            scratch_shapes=[
                pltpu.VMEM((tr, _LANES), jnp.float32),   # weighted-NLL partials
                pltpu.VMEM((tr, _LANES), jnp.float32),   # weight-sum partials
            ],
        ),
        compiler_params=pltpu.CompilerParams(
            dimension_semantics=("parallel", "arbitrary"),
            vmem_limit_bytes=32 * 1024 * 1024,           # safe on v5e/v6e/v7x
        ),
    )(logits_3d, labels_2d)

    num = jnp.sum(partials[:, 0, 0])
    den = jnp.sum(partials[:, 1, 0])
    # Exact divide; den == 0 (empty batch) gives NaN, matching PyTorch's 0/0.
    return {"loss": num / den}


def _reference_loss(logits, labels, class_weights):
    """Pure-JAX PyTorch-semantics reference."""
    logits = logits.astype(jnp.float32)
    logp = jax.nn.log_softmax(logits, axis=-1)
    nll = -jnp.take_along_axis(logp, labels[:, None].astype(jnp.int32),
                               axis=-1)[:, 0]
    w_i = jnp.asarray(class_weights, jnp.float32)[labels]
    return jnp.sum(w_i * nll) / jnp.sum(w_i)


if __name__ == "__main__":
    key = jax.random.PRNGKey(0)
    k1, k2, k3, k4, k5, k6 = jax.random.split(key, 6)

    class_weights = (1.0, 9.0)   # hardcoded in RawNetLoss.__init__

    # 1) Small RawNet2 binary head: batch=8, classes=2 (single tile + padding).
    B, C = 8, 2
    logits = jax.random.normal(k1, (B, C), dtype=jnp.float32)
    labels = jax.random.randint(k2, (B,), 0, C, dtype=jnp.int32)
    loss = jax.block_until_ready(rawnet_loss(logits, labels)["loss"])
    ref = _reference_loss(logits, labels, class_weights)
    assert jnp.allclose(loss, ref, atol=1e-5, rtol=1e-5), (loss, ref)

    # 2) Multi-step accumulation on one split (nsplit=1), batch padding.
    B2 = 3000
    logits2 = jax.random.normal(k3, (B2, C), dtype=jnp.float32)
    labels2 = jax.random.randint(k4, (B2,), 0, C, dtype=jnp.int32)
    loss2 = jax.block_until_ready(
        rawnet_loss(logits2, labels2, row_tile=8)["loss"])
    ref2 = _reference_loss(logits2, labels2, class_weights)
    assert jnp.allclose(loss2, ref2, atol=1e-5, rtol=1e-5), (loss2, ref2)

    # 3) bf16 logits, long grid -> 2-way "parallel" split + padding.
    B3 = 20000
    logits3 = jax.random.normal(k5, (B3, C), dtype=jnp.float32).astype(jnp.bfloat16)
    labels3 = jax.random.randint(k6, (B3,), 0, C, dtype=jnp.int32)
    loss3 = jax.block_until_ready(
        rawnet_loss(logits3, labels3, row_tile=32)["loss"])
    ref3 = _reference_loss(logits3, labels3, class_weights)
    assert jnp.allclose(loss3, ref3, atol=1e-4, rtol=1e-4), (loss3, ref3)

    print("KERNEL_OK")
</pallas_src>

<mosaic_0001>
module attributes {stable_mosaic.version = 11 : i64} {
  func.func @_weighted_ce_kernel(%arg0: i32, %arg1: i32, %arg2: memref<2x8x128xf32, #tpu.memory_space<vmem>>, %arg3: memref<8x128xi32, #tpu.memory_space<vmem>>, %arg4: memref<1x8x128xf32, #tpu.memory_space<vmem>>, %arg5: memref<8x128xf32, #tpu.memory_space<vmem>>, %arg6: memref<8x128xf32, #tpu.memory_space<vmem>>) attributes {dimension_semantics = [#tpu.dimension_semantics<parallel>, #tpu.dimension_semantics<arbitrary>], iteration_bounds = array<i64: 1, 1>, scalar_prefetch = 0 : i64, scratch_operands = 2 : i64, tpu.core_type = #tpu.core_type<tc>, window_params = [{transform_indices = @transform_0, window_bounds = array<i64: 2, 8, 128>}, {transform_indices = @transform_1, window_bounds = array<i64: 8, 128>}, {transform_indices = @transform_2, window_bounds = array<i64: 1, 8, 128>}]} {
    %c0_i32 = arith.constant 0 : i32
    %0 = arith.cmpi eq, %arg1, %c0_i32 : i32
    %1 = arith.extui %0 : i1 to i32
    %c0_i32_0 = arith.constant 0 : i32
    %2 = arith.cmpi ne, %1, %c0_i32_0 : i32
    scf.if %2 {
      %cst_24 = arith.constant 0.000000e+00 : f32
      %42 = vector.broadcast %cst_24 : f32 to vector<8x128xf32>
      %c0_25 = arith.constant 0 : index
      %c0_26 = arith.constant 0 : index
      %43 = vector.load %arg5[%c0_25, %c0_26] : memref<8x128xf32, #tpu.memory_space<vmem>>, vector<8x128xf32>
      tpu.vector_store %arg5[%c0_25, %c0_26], %42 {strides = array<i32>} : memref<8x128xf32, #tpu.memory_space<vmem>>, vector<8x128xf32>,
      %cst_27 = arith.constant 0.000000e+00 : f32
      %44 = vector.broadcast %cst_27 : f32 to vector<8x128xf32>
      %c0_28 = arith.constant 0 : index
      %c0_29 = arith.constant 0 : index
      %45 = vector.load %arg6[%c0_28, %c0_29] : memref<8x128xf32, #tpu.memory_space<vmem>>, vector<8x128xf32>
      tpu.vector_store %arg6[%c0_28, %c0_29], %44 {strides = array<i32>} : memref<8x128xf32, #tpu.memory_space<vmem>>, vector<8x128xf32>,
    } else {
    }
    %c0 = arith.constant 0 : index
    %c0_1 = arith.constant 0 : index
    %c0_2 = arith.constant 0 : index
    %3 = vector.load %arg2[%c0, %c0_1, %c0_2] : memref<2x8x128xf32, #tpu.memory_space<vmem>>, vector<1x8x128xf32>
    %4 = vector.shape_cast %3 : vector<1x8x128xf32> to vector<8x128xf32>
    %c1 = arith.constant 1 : index
    %c0_3 = arith.constant 0 : index
    %c0_4 = arith.constant 0 : index
    %5 = vector.load %arg2[%c1, %c0_3, %c0_4] : memref<2x8x128xf32, #tpu.memory_space<vmem>>, vector<1x8x128xf32>
    %6 = vector.shape_cast %5 : vector<1x8x128xf32> to vector<8x128xf32>
    %c0_5 = arith.constant 0 : index
    %c0_6 = arith.constant 0 : index
    %7 = vector.load %arg3[%c0_5, %c0_6] : memref<8x128xi32, #tpu.memory_space<vmem>>, vector<8x128xi32>
    %c1_i32 = arith.constant 1 : i32
    %8 = vector.broadcast %c1_i32 : i32 to vector<8x128xi32>
    %9 = arith.cmpi eq, %7, %8 : vector<8x128xi32>
    %c0_i32_7 = arith.constant 0 : i32
    %10 = vector.broadcast %c0_i32_7 : i32 to vector<8x128xi32>
    %11 = arith.cmpi sge, %7, %10 : vector<8x128xi32>
    %12 = arith.subf %6, %4 : vector<8x128xf32>
    %13 = arith.subf %4, %6 : vector<8x128xf32>
    %14 = arith.select %9, %12, %13 : vector<8x128xi1>, vector<8x128xf32>
    %cst = arith.constant 0.000000e+00 : f32
    %15 = vector.broadcast %cst : f32 to vector<8x128xf32>
    %16 = arith.subf %15, %14 : vector<8x128xf32>
    %cst_8 = arith.constant 0.000000e+00 : f32
    %17 = vector.broadcast %cst_8 : f32 to vector<8x128xf32>
    %18 = arith.maximumf %16, %17 : vector<8x128xf32>
    %19 = math.absf %14 : vector<8x128xf32>
    %cst_9 = arith.constant 0.000000e+00 : f32
    %20 = vector.broadcast %cst_9 : f32 to vector<8x128xf32>
    %21 = arith.subf %20, %19 : vector<8x128xf32>
    %22 = math.exp %21 : vector<8x128xf32>
    %cst_10 = arith.constant 1.000000e+00 : f32
    %23 = vector.broadcast %cst_10 : f32 to vector<8x128xf32>
    %24 = arith.addf %23, %22 : vector<8x128xf32>
    %25 = math.log %24 : vector<8x128xf32>
    %26 = arith.addf %18, %25 : vector<8x128xf32>
    %cst_11 = arith.constant 9.000000e+00 : f32
    %cst_12 = arith.constant 1.000000e+00 : f32
    %27 = vector.broadcast %cst_11 : f32 to vector<8x128xf32>
    %28 = vector.broadcast %cst_12 : f32 to vector<8x128xf32>
    %29 = arith.select %9, %27, %28 : vector<8x128xi1>, vector<8x128xf32>
    %cst_13 = arith.constant 0.000000e+00 : f32
    %30 = vector.broadcast %cst_13 : f32 to vector<8x128xf32>
    %31 = arith.select %11, %29, %30 : vector<8x128xi1>, vector<8x128xf32>
    %c0_14 = arith.constant 0 : index
    %c0_15 = arith.constant 0 : index
    %32 = vector.load %arg5[%c0_14, %c0_15] : memref<8x128xf32, #tpu.memory_space<vmem>>, vector<8x128xf32>
    %33 = arith.mulf %31, %26 : vector<8x128xf32>
    %34 = arith.addf %32, %33 : vector<8x128xf32>
    %c0_16 = arith.constant 0 : index
    %c0_17 = arith.constant 0 : index
    %35 = vector.load %arg5[%c0_16, %c0_17] : memref<8x128xf32, #tpu.memory_space<vmem>>, vector<8x128xf32>
    tpu.vector_store %arg5[%c0_16, %c0_17], %34 {strides = array<i32>} : memref<8x128xf32, #tpu.memory_space<vmem>>, vector<8x128xf32>,
    %c0_18 = arith.constant 0 : index
    %c0_19 = arith.constant 0 : index
    %36 = vector.load %arg6[%c0_18, %c0_19] : memref<8x128xf32, #tpu.memory_space<vmem>>, vector<8x128xf32>
    %37 = arith.addf %36, %31 : vector<8x128xf32>
    %c0_20 = arith.constant 0 : index
    %c0_21 = arith.constant 0 : index
    %38 = vector.load %arg6[%c0_20, %c0_21] : memref<8x128xf32, #tpu.memory_space<vmem>>, vector<8x128xf32>
    tpu.vector_store %arg6[%c0_20, %c0_21], %37 {strides = array<i32>} : memref<8x128xf32, #tpu.memory_space<vmem>>, vector<8x128xf32>,
    %c0_i32_22 = arith.constant 0 : i32
    %39 = arith.cmpi eq, %arg1, %c0_i32_22 : i32
    %40 = arith.extui %39 : i1 to i32
    %c0_i32_23 = arith.constant 0 : i32
    %41 = arith.cmpi ne, %40, %c0_i32_23 : i32
    scf.if %41 {
      %c0_24 = arith.constant 0 : index
      %c0_25 = arith.constant 0 : index
      %42 = vector.load %arg5[%c0_24, %c0_25] : memref<8x128xf32, #tpu.memory_space<vmem>>, vector<8x128xf32>
      %43 = vector.shape_cast %42 : vector<8x128xf32> to vector<1x8x128xf32>
      %cst_26 = arith.constant dense<0.000000e+00> : vector<1xf32>
      %44 = vector.multi_reduction <add>, %43, %cst_26 [1, 2] : vector<1x8x128xf32> to vector<1xf32>
      %45 = vector.shape_cast %44 : vector<1xf32> to vector<1x1x1xf32>
      %46 = vector.extract %45[0, 0, 0] : f32 from vector<1x1x1xf32>
      %c0_27 = arith.constant 0 : index
      %c0_28 = arith.constant 0 : index
      %47 = vector.load %arg6[%c0_27, %c0_28] : memref<8x128xf32, #tpu.memory_space<vmem>>, vector<8x128xf32>
      %48 = vector.shape_cast %47 : vector<8x128xf32> to vector<1x8x128xf32>
      %cst_29 = arith.constant dense<0.000000e+00> : vector<1xf32>
      %49 = vector.multi_reduction <add>, %48, %cst_29 [1, 2] : vector<1x8x128xf32> to vector<1xf32>
      %50 = vector.shape_cast %49 : vector<1xf32> to vector<1x1x1xf32>
      %51 = vector.extract %50[0, 0, 0] : f32 from vector<1x1x1xf32>
      %52 = tpu.iota {dimensions = array<i32: 0>} : vector<8x128xi32>
      %c0_i32_30 = arith.constant 0 : i32
      %53 = vector.broadcast %c0_i32_30 : i32 to vector<8x128xi32>
      %54 = arith.cmpi eq, %52, %53 : vector<8x128xi32>
      %c1_i32_31 = arith.constant 1 : i32
      %55 = vector.broadcast %c1_i32_31 : i32 to vector<8x128xi32>
      %56 = arith.cmpi eq, %52, %55 : vector<8x128xi32>
      %cst_32 = arith.constant 0.000000e+00 : f32
      %57 = vector.broadcast %51 : f32 to vector<8x128xf32>
      %58 = vector.broadcast %cst_32 : f32 to vector<8x128xf32>
      %59 = arith.select %56, %57, %58 : vector<8x128xi1>, vector<8x128xf32>
      %60 = vector.broadcast %46 : f32 to vector<8x128xf32>
      %61 = arith.select %54, %60, %59 : vector<8x128xi1>, vector<8x128xf32>
      %c0_33 = arith.constant 0 : index
      %c0_34 = arith.constant 0 : index
      %c0_35 = arith.constant 0 : index
      %62 = vector.load %arg4[%c0_33, %c0_34, %c0_35] : memref<1x8x128xf32, #tpu.memory_space<vmem>>, vector<1x8x128xf32>
      %63 = vector.shape_cast %62 : vector<1x8x128xf32> to vector<8x128xf32>
      %64 = vector.shape_cast %61 : vector<8x128xf32> to vector<1x8x128xf32>
      tpu.vector_store %arg4[%c0_33, %c0_34, %c0_35], %64 {strides = array<i32>} : memref<1x8x128xf32, #tpu.memory_space<vmem>>, vector<1x8x128xf32>,
    } else {
    }
    return
  }
  func.func @transform_0(%arg0: i32, %arg1: i32) -> (i32, i32, i32) {
    %c1_i32 = arith.constant 1 : i32
    %0 = arith.muli %arg0, %c1_i32 : i32
    %1 = arith.addi %0, %arg1 : i32
    %c0_i32 = arith.constant 0 : i32
    %c0_i32_0 = arith.constant 0 : i32
    %c0_i32_1 = arith.constant 0 : i32
    return %c0_i32, %1, %c0_i32_0 : i32, i32, i32
  }
  func.func @transform_1(%arg0: i32, %arg1: i32) -> (i32, i32) {
    %c1_i32 = arith.constant 1 : i32
    %0 = arith.muli %arg0, %c1_i32 : i32
    %1 = arith.addi %0, %arg1 : i32
    %c0_i32 = arith.constant 0 : i32
    %c0_i32_0 = arith.constant 0 : i32
    return %1, %c0_i32 : i32, i32
  }
  func.func @transform_2(%arg0: i32, %arg1: i32) -> (i32, i32, i32) {
    %c0_i32 = arith.constant 0 : i32
    %c0_i32_0 = arith.constant 0 : i32
    %c0_i32_1 = arith.constant 0 : i32
    return %arg0, %c0_i32, %c0_i32_0 : i32, i32, i32
  }
}

</mosaic_0001>

<bundles_post_ra>
// kernel: tpu_custom_call.1
= control target key start
LH: loop header
LB: loop body
LE: loop exit
PB: predicated region body
PF: predicated region fallthrough
CT: control target
= control target key end

     0   :  { %7 = vsyncpa [#allocation5], 0  ;;  %s238_s0 = inlined_call_operand.hbm [shape: f32[2,8,128], index: 0, kind: input, shape index: {}]   ;;  %s239_s1 = inlined_call_operand.hbm [shape: s32[8,128], index: 1, kind: input, shape index: {}]   ;;  %s240_s2 = inlined_call_operand.hbm [shape: f32[1,8,128], index: 2, kind: output, shape index: {}]  }
   0x1   :  { %8 = vsyncpa [#allocation8], 0 }
   0x2   :  { %9 = vsyncpa [#allocation6], 0  ;;  %s208_s9 = smov [#allocation4]  }
   0x3   :  { %s18_s10 = sshll.u32 %s208_s9, 4  ;;  %s19_s10 = int_to_ptr.vmem [resolvable:$true] %s18_s10 }
   0x4   :  { %s150_s11 = scalar_lea.vmem %s19_s10, 256  ;;  %p155_p1 = scmp.lt.s32.totalorder %s19_s10, %s19_s10 }
   0x5   :  { %p151_p0 = scmp.ne.s32.totalorder %s19_s10, %s150_s11  ;;  %p156_p2 = scmp.lt.s32.totalorder %s150_s11, %s150_s11 }
   0x7   :  { %p157_p3 = por %p156_p2, %p155_p1 }
   0x9   :  { %p158_p4 = pnand %p157_p3, %p151_p0 }
   0xb   :  { %161 = shalt.err (!%p158_p4)
}
   0xc   :  { %s209_s12 = smov 128   ;;  %s210_s13 = smov 8  }
   0xd   :  { %24 = dma.hbm_to_vmem [thread:$0]  %s238_s0, 256, %s19_s10, [#allocation5], %s209_s12, %s209_s12, %s210_s13  }
   0xe   :  { %s211_s16 = smov [#allocation7]  }
   0xf   :  { %s34_s17 = sshll.u32 %s211_s16, 4  ;;  %s35_s17 = int_to_ptr.vmem [resolvable:$true] %s34_s17 }
  0x10   :  { %s170_s18 = scalar_lea.vmem %s35_s17, 128  ;;  %p175_p6 = scmp.lt.s32.totalorder %s35_s17, %s35_s17 }
  0x11   :  { %p171_p5 = scmp.ne.s32.totalorder %s35_s17, %s170_s18  ;;  %p176_p7 = scmp.lt.s32.totalorder %s170_s18, %s170_s18 }
  0x13   :  { %p177_p8 = por %p176_p7, %p175_p6 }
  0x15   :  { %p178_p9 = pnand %p177_p8, %p171_p5 }
  0x17   :  { %181 = shalt.err (!%p178_p9)
}
  0x18   :  { %37 = dma.hbm_to_vmem [thread:$0]  %s239_s1, 128, %s35_s17, [#allocation8]  }
  0x19   :  { %202 = dma.done.wait [#allocation5], 256  }
  0x1a   :  { %203 = vsyncadd [#allocation5], 4294967040 }
  0x1b   :  { %204 = dma.done.wait [#allocation8], 128  }
  0x1c   :  { %205 = vsyncadd [#allocation8], 4294967168  ;;  %v52_v0 = vld [vmem:[#allocation4] sm:$0xff]  ;;  %v54_v1 = vld [vmem:[#allocation4 + $0x8] sm:$0xff]  ;;  %v212_v13 = vmov 1.0   ;;  %v103_v34 = vlaneseq  ;;  %s213_s1 = smov [#allocation9]  }
  0x1d   :  { %v55_v2 = vld [vmem:[#allocation7] sm:$0xff]  ;;  %v58_v3 = vsub.f32 %v54_v1, %v52_v0  ;;  %v59_v4 = vsub.f32 %v52_v0, %v54_v1  ;;  %s118_s21 = sshll.u32 %s213_s1, 4  ;;  %s119_s21 = int_to_ptr.vmem [resolvable:$true] %s118_s21 }
  0x1e   :  { %vm56_vm0 = vcmp.eq.s32.totalorder %v55_v2, 1  ;;  %vm57_vm1 = vcmp.ge.s32.totalorder %v55_v2, 0  ;;  %v104_v35 = vshrl.u32 %v103_v34, 7  ;;  %s182_s23 = scalar_lea.vmem %s119_s21, 128  ;;  %p187_p11 = scmp.lt.s32.totalorder %s119_s21, %s119_s21 }
  0x1f   :  { %v60_v5 = vsel %vm56_vm0, %v58_v3, %v59_v4  ;;  %v71_v14 = vsel %vm56_vm0, 9.0, %v212_v13  ;;  %p183_p10 = scmp.ne.s32.totalorder %s119_s21, %s182_s23  ;;  %p188_p12 = scmp.lt.s32.totalorder %s182_s23, %s182_s23 }
  0x20   :  { %v63_v6 = vand.u32 2147483647, %v60_v5  ;;  %v61_v11 = vsub.f32 0.0, %v60_v5  ;;  %v72_v17 = vsel %vm57_vm1, %v71_v14, 0.0  ;;  %vm106_vm2 = vcmp.eq.s32.totalorder %v104_v35, 1 }
  0x21   :  { %vm105_vm3 = vcmp.eq.s32.totalorder %v104_v35, 0  ;;  %p189_p13 = por %p188_p12, %p187_p11 }
  0x22   :  { %v64_v7 = vsub.f32 0.0, %v63_v6  ;;  %v62_v12 = vmax.f32 %v61_v11, 0.0 }
  0x23   :  { %p190_p0 = pnand %p189_p13, %p183_p10 }
  0x24   :  { %v65_v8 = vmul.f32 1.442695, %v64_v7 }
  0x26   :  { %138 = vpow2.f32 %v65_v8 }
  0x33   :  { %v139_v9 = vpop.eup %138 }
  0x34   :  { %v67_v10 = vadd.f32 1.0, %v139_v9 }
  0x36   :  { %140 = vlog2.f32 %v67_v10 }
  0x43   :  { %v141_v15 = vpop.eup %140 }
  0x44   :  { %v69_v16 = vmul.f32 0.6931472, %v141_v15 }
  0x46   :  { %v70_v18 = vadd.f32 %v69_v16, %v62_v12 }
  0x48   :  { %v74_v19 = vmul.f32 %v72_v17, %v70_v18 }
  0x4a   :  { %84 = vadd.xlane.f32.xlu0 %v74_v19 }
  0x4e   :  { %94 = vadd.xlane.f32.xlu0 %v72_v17 }
  0xd3   :  { %v85_v20 = vpop.xlane.xlu0 %84 }
  0xd4   :  { %v86_v21 = vrot.slane %v85_v20, 4 }
  0xd6   :  { %v87_v22 = vadd.f32 %v86_v21, %v85_v20 }
  0xd7   :  { %v95_v23 = vpop.xlane.xlu0 %94 }
  0xd8   :  { %v88_v24 = vrot.slane %v87_v22, 2  ;;  %v96_v25 = vrot.slane %v95_v23, 4 }
  0xda   :  { %v97_v26 = vadd.f32 %v96_v25, %v95_v23  ;;  %v89_v27 = vadd.f32 %v88_v24, %v87_v22 }
  0xdc   :  { %v98_v28 = vrot.slane %v97_v26, 2  ;;  %v90_v29 = vrot.slane %v89_v27, 1 }
  0xde   :  { %v99_v30 = vadd.f32 %v98_v28, %v97_v26  ;;  %v91_v31 = vadd.f32 %v90_v29, %v89_v27 }
  0xe0   :  { %128 = vpush %v91_v31  ;;  %v100_v32 = vrot.slane %v99_v30, 1 }
  0xe2   :  { %v101_v33 = vadd.f32 %v100_v32, %v99_v30 }
  0xe4   :  { %130 = vpush %v101_v33 }
 0x111   :  { %s129_s0 = spop %128 }
 0x112   :  { %v109_v37 = vstv %s129_s0 }
 0x115   :  { %s131_s22 = spop %130 }
 0x116   :  { %v107_v36 = vstv %s131_s22 }
 0x117   :  { %v108_v38 = vsel %vm106_vm2, %v107_v36, 0.0 }
 0x118   :  { %v110_v39 = vsel %vm105_vm3, %v109_v37, %v108_v38 }
 0x119   :  { %111 = vst [vmem:[#allocation9] sm:$0xff] %v110_v39 }
 0x11a   :  { %193 = shalt.err (!%p190_p0)
}
 0x11b   :  { %121 = dma.vmem_to_hbm [thread:$0]  %s119_s21, 128, %s240_s2, [#allocation6]  }
 0x11c   :  { %206 = dma.done.wait [#allocation6], 128  }
 0x11d   :  { %207 = vsyncadd [#allocation6], 4294967168 }
 0x11e   :  { %125 = vsyncpa [#allocation5], 1 }
 0x11f   :  { %126 = vsyncpa [#allocation8], 1 }
 0x120   :  { %127 = vsyncpa [#allocation6], 1 }

</bundles_post_ra>
